<compile_context>
chip_gen: v7x
topology: tpu7x:2x2x1
jax: 0.10.0
libtpu: 0.0.40
codegen_flags: <defaults>
</compile_context>

<pallas_src>
import jax
import jax.numpy as jnp
from jax.experimental import pallas as pl
from jax.experimental.pallas import tpu as pltpu


# ---------------------------------------------------------------------------
# Generation-aware budgets & tiling
# ---------------------------------------------------------------------------

def _budgets():
    """(max x-block bytes, vmem_limit cap) for the local TPU generation."""
    try:
        vmem = int(pltpu.get_tpu_info().vmem_capacity_bytes)
    except Exception:                 # detection failure -> assume tightest (v7x)
        vmem = 64 << 20
    if vmem >= (96 << 20):            # v5e / v6e: 128 MiB VMEM per TensorCore
        return 8 << 20, 64 << 20
    return 4 << 20, 40 << 20          # v7x: 64 MiB VMEM per TensorCore


def _pick_tn(n, row_bytes, max_block_bytes, *, target_steps=8,
             min_block_bytes=1 << 20):
    """Batch rows per grid step for the fused kernel.

    Priorities:
      * double-buffered in+out blocks fit the per-generation byte budget,
      * >= target_steps grid iterations (>= ~4 per v7x TensorCore) so input
        DMA / compute / writeback actually overlap -- as long as blocks stay
        >= ~1 MiB (still ~85% of HBM roofline),
      * minimal batch padding: padded rows are 1:1 wasted HBM bandwidth.
    """
    row_bytes = max(row_bytes, 1)
    tn = max(1, min(n, max_block_bytes // row_bytes))

    tn_steps = max(1, -(-n // target_steps))          # ceil(n / target_steps)
    if tn_steps < tn:
        min_rows = max(1, -(-min_block_bytes // row_bytes))
        tn = max(tn_steps, min(min_rows, tn))

    def _pad(t):
        return (-n) % t

    lo = max(1, tn // 2)
    tn = min(range(lo, tn + 1), key=lambda t: (_pad(t), -t))
    return int(tn)


# ---------------------------------------------------------------------------
# Kernels
# ---------------------------------------------------------------------------

def _make_fused_kernel(inv_l):
    """Single-pass SE: pool + excite + scale on one (TN, C, Lp) block."""

    def kernel(x_ref, w1t_ref, b1_ref, w2t_ref, b2_ref, o_ref):
        # Squeeze: f32-accumulated sum over the (zero-padded) lane axis,
        # scaled by the true 1/L. No persistent f32 copy of the block.
        pooled = jnp.sum(x_ref[...], axis=-1, dtype=jnp.float32) * inv_l   # (TN, C)

        # Excitation: 1x1 convs as channel matmuls (weights pre-transposed).
        h = jnp.dot(pooled, w1t_ref[...],
                    preferred_element_type=jnp.float32) + b1_ref[...]      # (TN, B)
        h = jnp.maximum(h, 0.0)
        m = jnp.dot(h, w2t_ref[...],
                    preferred_element_type=jnp.float32) + b2_ref[...]      # (TN, C)
        mask = jax.nn.sigmoid(m)                                           # (TN, C)

        # Scale: re-read x in its native dtype (bf16 multiply differs from the
        # f32-multiply-then-cast reference by at most one ulp).
        o_ref[...] = x_ref[...] * mask.astype(o_ref.dtype)[:, :, None]

    return kernel


def _make_pool_excite_kernel(inv_l):
    """Fallback pass 1: accumulate the pool over L chunks, then excite."""

    def kernel(x_ref, w1t_ref, b1_ref, w2t_ref, b2_ref, mask_ref, acc_ref):
        l = pl.program_id(1)

        @pl.when(l == 0)
        def _():
            acc_ref[...] = jnp.zeros_like(acc_ref)

        acc_ref[...] += jnp.sum(x_ref[...], axis=-1, dtype=jnp.float32)

        @pl.when(l == pl.num_programs(1) - 1)
        def _():
            pooled = acc_ref[...] * inv_l                                  # (TN, C)
            h = jnp.maximum(
                jnp.dot(pooled, w1t_ref[...],
                        preferred_element_type=jnp.float32) + b1_ref[...], 0.0)
            m = jnp.dot(h, w2t_ref[...],
                        preferred_element_type=jnp.float32) + b2_ref[...]
            mask_ref[...] = jax.nn.sigmoid(m)[:, None, :]                  # (TN, 1, C)

    return kernel


def _scale_kernel(x_ref, mask_ref, o_ref):
    """Fallback pass 2: lane-tiled scale by the broadcast channel gate."""
    o_ref[...] = x_ref[...] * mask_ref[...].astype(o_ref.dtype)


# ---------------------------------------------------------------------------
# Wrappers
# ---------------------------------------------------------------------------

def _se_fused(x, w1t, b1r, w2t, b2r, *, max_block_bytes, vmem_cap):
    N, C, L = x.shape
    B = w1t.shape[1]
    io_itemsize = jnp.dtype(x.dtype).itemsize

    Lp = pl.cdiv(L, 128) * 128                 # lane-dense -> unmasked stores
    row_bytes = C * Lp * io_itemsize           # native-dtype footprint only
    tn = _pick_tn(N, row_bytes, max_block_bytes)
    Np = pl.cdiv(N, tn) * tn

    pad_n, pad_l = Np - N, Lp - L
    x_p = jnp.pad(x, ((0, pad_n), (0, 0), (0, pad_l))) if (pad_n or pad_l) else x

    weight_bytes = (2 * C * B + B + C) * 4
    needed = 4 * tn * row_bytes + 2 * weight_bytes + (2 << 20)
    vmem_limit = int(min(vmem_cap, max(needed, 32 << 20)))

    # Advisory: a pure HBM-bandwidth pass (bytes use the actual padded traffic).
    cost = pl.CostEstimate(
        flops=int(3 * Np * C * Lp + 4 * Np * C * B),
        transcendentals=int(Np * C),
        bytes_accessed=int(2 * Np * C * Lp * io_itemsize + weight_bytes),
    )

    out_p = pl.pallas_call(
        _make_fused_kernel(1.0 / float(L)),
        out_shape=jax.ShapeDtypeStruct((Np, C, Lp), x.dtype),
        grid_spec=pltpu.PrefetchScalarGridSpec(
            num_scalar_prefetch=0,
            grid=(Np // tn,),
            in_specs=[
                pl.BlockSpec((tn, C, Lp), lambda n: (n, 0, 0)),   # x tile
                # Constant-index parameter blocks: kept resident, no re-DMA.
                pl.BlockSpec((C, B), lambda n: (0, 0)),           # W1^T
                pl.BlockSpec((1, B), lambda n: (0, 0)),           # b1
                pl.BlockSpec((B, C), lambda n: (0, 0)),           # W2^T
                pl.BlockSpec((1, C), lambda n: (0, 0)),           # b2
            ],
            out_specs=pl.BlockSpec((tn, C, Lp), lambda n: (n, 0, 0)),
        ),
        compiler_params=pltpu.CompilerParams(
            dimension_semantics=("parallel",),
            vmem_limit_bytes=vmem_limit,
        ),
        cost_estimate=cost,
    )(x_p, w1t, b1r, w2t, b2r)

    return out_p[:N, :, :L] if (pad_n or pad_l) else out_p


def _se_two_pass(x, w1t, b1r, w2t, b2r, *, max_block_bytes, vmem_cap):
    """Used when a single (1, C, Lp) row overflows the fused path's VMEM budget
    (large C*L on v7x's 64 MiB/TC). x is read twice -> 1.5x HBM traffic."""
    N, C, L = x.shape
    B = w1t.shape[1]
    io_itemsize = jnp.dtype(x.dtype).itemsize

    # L chunk: multiple of 128 lanes, sized to the block budget, keeping
    # >= ~4 L steps for pipeline depth when possible.
    n_lane_chunks = pl.cdiv(L, 128)
    chunk_bytes = max(C * 128 * io_itemsize, 1)
    k = max(1, min(max_block_bytes // chunk_bytes, n_lane_chunks))
    k = max(1, min(k, -(-n_lane_chunks // 4)))
    tl = 128 * k
    Lp = pl.cdiv(L, tl) * tl

    row_block_bytes = max(C * tl * io_itemsize, 1)
    tn = max(1, min(N, max_block_bytes // row_block_bytes))
    Np = pl.cdiv(N, tn) * tn

    pad_n, pad_l = Np - N, Lp - L
    x_p = jnp.pad(x, ((0, pad_n), (0, 0), (0, pad_l))) if (pad_n or pad_l) else x

    weight_bytes = (2 * C * B + B + C) * 4
    vmem_limit = int(min(vmem_cap,
                         max(4 * tn * row_block_bytes + 2 * weight_bytes + (2 << 20),
                             32 << 20)))

    # Pass 1: pooled-and-excited channel gate, shape (Np, 1, C) f32.
    mask = pl.pallas_call(
        _make_pool_excite_kernel(1.0 / float(L)),
        out_shape=jax.ShapeDtypeStruct((Np, 1, C), jnp.float32),
        grid_spec=pltpu.PrefetchScalarGridSpec(
            num_scalar_prefetch=0,
            grid=(Np // tn, Lp // tl),
            in_specs=[
                pl.BlockSpec((tn, C, tl), lambda n, l: (n, 0, l)),
                pl.BlockSpec((C, B), lambda n, l: (0, 0)),
                pl.BlockSpec((1, B), lambda n, l: (0, 0)),
                pl.BlockSpec((B, C), lambda n, l: (0, 0)),
                pl.BlockSpec((1, C), lambda n, l: (0, 0)),
            ],
            out_specs=pl.BlockSpec((tn, 1, C), lambda n, l: (n, 0, 0)),
            scratch_shapes=[pltpu.VMEM((tn, C), jnp.float32)],
        ),
        compiler_params=pltpu.CompilerParams(
            dimension_semantics=("parallel", "arbitrary"),
            vmem_limit_bytes=vmem_limit,
        ),
    )(x_p, w1t, b1r, w2t, b2r)

    # Tiny (N, C) transpose in XLA so pass 2 gets a (tn, C, 1) gate that
    # broadcasts over lanes with no in-kernel relayout.
    mask_b = jnp.swapaxes(mask, 1, 2)                          # (Np, C, 1)

    # Pass 2: lane-tiled scale.
    out_p = pl.pallas_call(
        _scale_kernel,
        out_shape=jax.ShapeDtypeStruct((Np, C, Lp), x.dtype),
        grid_spec=pltpu.PrefetchScalarGridSpec(
            num_scalar_prefetch=0,
            grid=(Np // tn, Lp // tl),
            in_specs=[
                pl.BlockSpec((tn, C, tl), lambda n, l: (n, 0, l)),
                pl.BlockSpec((tn, C, 1), lambda n, l: (n, 0, 0)),
            ],
            out_specs=pl.BlockSpec((tn, C, tl), lambda n, l: (n, 0, l)),
        ),
        compiler_params=pltpu.CompilerParams(
            dimension_semantics=("parallel", "parallel"),
            vmem_limit_bytes=vmem_limit,
        ),
    )(x_p, mask_b)

    return out_p[:N, :, :L] if (pad_n or pad_l) else out_p


def se_module(x, w1, b1, w2, b2, *, force_two_pass=False):
    """x: (N, C, L); w1: (B, C); b1: (B,); w2: (C, B); b2: (C,)."""
    N, C, L = x.shape
    B = w1.shape[0]
    io_itemsize = jnp.dtype(x.dtype).itemsize

    max_block_bytes, vmem_cap = _budgets()

    # Pre-transpose weights once in XLA so the kernels do row-major matmuls;
    # all parameters stay f32 for in-kernel accumulation.
    w1t = jnp.asarray(w1, jnp.float32).T          # (C, B)
    w2t = jnp.asarray(w2, jnp.float32).T          # (B, C)
    b1r = jnp.asarray(b1, jnp.float32).reshape(1, B)
    b2r = jnp.asarray(b2, jnp.float32).reshape(1, C)

    weight_bytes = (2 * C * B + B + C) * 4
    single_row_bytes = C * (pl.cdiv(L, 128) * 128) * io_itemsize
    fits_fused = (4 * single_row_bytes + 2 * weight_bytes + (4 << 20)) <= vmem_cap

    if force_two_pass or not fits_fused:
        return _se_two_pass(x, w1t, b1r, w2t, b2r,
                            max_block_bytes=max_block_bytes, vmem_cap=vmem_cap)
    return _se_fused(x, w1t, b1r, w2t, b2r,
                     max_block_bytes=max_block_bytes, vmem_cap=vmem_cap)


def se_reference(x, w1, b1, w2, b2):
    xf = x.astype(jnp.float32)
    pooled = jnp.mean(xf, axis=-1)                              # (N, C)
    h = jnp.maximum(pooled @ w1.T + b1[None, :], 0.0)           # (N, B)
    m = h @ w2.T + b2[None, :]                                  # (N, C)
    return (xf * jax.nn.sigmoid(m)[:, :, None]).astype(x.dtype)


if __name__ == "__main__":
    # Small deterministic shapes consistent with the module's forward:
    # x: (batch, channels, length); L=200 exercises the pad-to-128 path.
    N, C, L, B = 8, 16, 200, 32

    key = jax.random.PRNGKey(0)
    kx, k1, k2, k3, k4 = jax.random.split(key, 5)

    x = jax.random.normal(kx, (N, C, L), dtype=jnp.float32)
    # Conv1d weights: PyTorch shape (out, in, 1) with the kernel dim squeezed.
    w1 = jax.random.normal(k1, (B, C), dtype=jnp.float32) * 0.1
    b1 = jax.random.normal(k2, (B,), dtype=jnp.float32) * 0.1
    w2 = jax.random.normal(k3, (C, B), dtype=jnp.float32) * 0.1
    b2 = jax.random.normal(k4, (C,), dtype=jnp.float32) * 0.1

    ref = se_reference(x, w1, b1, w2, b2)

    # Fused single-pass path, f32 I/O.
    out = jax.block_until_ready(se_module(x, w1, b1, w2, b2))
    assert out.shape == x.shape and out.dtype == x.dtype
    assert jnp.allclose(out, ref, atol=1e-5, rtol=1e-5), "f32 fused mismatch"

    # Fused path, bf16 I/O (halves HBM traffic; accumulation stays f32).
    xb = x.astype(jnp.bfloat16)
    outb = jax.block_until_ready(se_module(xb, w1, b1, w2, b2))
    refb = se_reference(xb, w1, b1, w2, b2).astype(jnp.float32)
    assert outb.shape == xb.shape and outb.dtype == jnp.bfloat16
    assert jnp.allclose(outb.astype(jnp.float32), refb, atol=5e-2, rtol=5e-2), \
        "bf16 fused mismatch"

    # Two-pass fallback path (as taken when one row overflows the v7x budget).
    out2 = jax.block_until_ready(se_module(x, w1, b1, w2, b2, force_two_pass=True))
    assert out2.shape == x.shape and out2.dtype == x.dtype
    assert jnp.allclose(out2, ref, atol=1e-5, rtol=1e-5), "two-pass mismatch"

    print("KERNEL_OK")
</pallas_src>

<mosaic_0001>
module attributes {stable_mosaic.version = 11 : i64} {
  func.func @kernel(%arg0: i32, %arg1: memref<8x16x256xf32, #tpu.memory_space<vmem>>, %arg2: memref<16x32xf32, #tpu.memory_space<vmem>>, %arg3: memref<1x32xf32, #tpu.memory_space<vmem>>, %arg4: memref<32x16xf32, #tpu.memory_space<vmem>>, %arg5: memref<1x16xf32, #tpu.memory_space<vmem>>, %arg6: memref<8x16x256xf32, #tpu.memory_space<vmem>>) attributes {dimension_semantics = [#tpu.dimension_semantics<parallel>], iteration_bounds = array<i64: 1>, scalar_prefetch = 0 : i64, scratch_operands = 0 : i64, tpu.core_type = #tpu.core_type<tc>, window_params = [{transform_indices = @transform_0, window_bounds = array<i64: 8, 16, 256>}, {pipeline_mode = #tpu.pipeline_mode<synchronous>, transform_indices = @transform_1, window_bounds = array<i64: 16, 32>}, {pipeline_mode = #tpu.pipeline_mode<synchronous>, transform_indices = @transform_2, window_bounds = array<i64: 1, 32>}, {pipeline_mode = #tpu.pipeline_mode<synchronous>, transform_indices = @transform_3, window_bounds = array<i64: 32, 16>}, {pipeline_mode = #tpu.pipeline_mode<synchronous>, transform_indices = @transform_4, window_bounds = array<i64: 1, 16>}, {transform_indices = @transform_5, window_bounds = array<i64: 8, 16, 256>}]} {
    %c0 = arith.constant 0 : index
    %c0_0 = arith.constant 0 : index
    %c0_1 = arith.constant 0 : index
    %0 = vector.load %arg1[%c0, %c0_0, %c0_1] : memref<8x16x256xf32, #tpu.memory_space<vmem>>, vector<8x16x256xf32>
    %cst = arith.constant dense<0.000000e+00> : vector<8x16xf32>
    %1 = vector.multi_reduction <add>, %0, %cst [2] : vector<8x16x256xf32> to vector<8x16xf32>
    %cst_2 = arith.constant 5.000000e-03 : f32
    %2 = vector.broadcast %cst_2 : f32 to vector<8x16xf32>
    %3 = arith.mulf %1, %2 : vector<8x16xf32>
    %c0_3 = arith.constant 0 : index
    %c0_4 = arith.constant 0 : index
    %4 = vector.load %arg2[%c0_3, %c0_4] : memref<16x32xf32, #tpu.memory_space<vmem>>, vector<16x32xf32>
    %cst_5 = arith.constant dense<0.000000e+00> : vector<8x32xf32>
    %5 = tpu.matmul %3, %4, %cst_5 {dimension_numbers = #tpu.dot_dimension_numbers<[1], [0], [0], [1], [0, 0, 1, 1], [], []>} : vector<8x16xf32>, vector<16x32xf32>, vector<8x32xf32> -> vector<8x32xf32>
    %c0_6 = arith.constant 0 : index
    %c0_7 = arith.constant 0 : index
    %6 = vector.load %arg3[%c0_6, %c0_7] : memref<1x32xf32, #tpu.memory_space<vmem>>, vector<1x32xf32>
    %7 = vector.broadcast %6 : vector<1x32xf32> to vector<8x32xf32>
    %8 = arith.addf %5, %7 : vector<8x32xf32>
    %cst_8 = arith.constant 0.000000e+00 : f32
    %9 = vector.broadcast %cst_8 : f32 to vector<8x32xf32>
    %10 = arith.maximumf %8, %9 : vector<8x32xf32>
    %c0_9 = arith.constant 0 : index
    %c0_10 = arith.constant 0 : index
    %11 = vector.load %arg4[%c0_9, %c0_10] : memref<32x16xf32, #tpu.memory_space<vmem>>, vector<32x16xf32>
    %cst_11 = arith.constant dense<0.000000e+00> : vector<8x16xf32>
    %12 = tpu.matmul %10, %11, %cst_11 {dimension_numbers = #tpu.dot_dimension_numbers<[1], [0], [0], [1], [0, 0, 1, 1], [], []>} : vector<8x32xf32>, vector<32x16xf32>, vector<8x16xf32> -> vector<8x16xf32>
    %c0_12 = arith.constant 0 : index
    %c0_13 = arith.constant 0 : index
    %13 = vector.load %arg5[%c0_12, %c0_13] : memref<1x16xf32, #tpu.memory_space<vmem>>, vector<1x16xf32>
    %14 = vector.broadcast %13 : vector<1x16xf32> to vector<8x16xf32>
    %15 = arith.addf %12, %14 : vector<8x16xf32>
    %16 = arith.negf %15 : vector<8x16xf32>
    %17 = math.exp %16 : vector<8x16xf32>
    %cst_14 = arith.constant 1.000000e+00 : f32
    %18 = vector.broadcast %cst_14 : f32 to vector<8x16xf32>
    %19 = arith.addf %18, %17 : vector<8x16xf32>
    %20 = arith.divf %18, %19 : vector<8x16xf32>
    %c0_15 = arith.constant 0 : index
    %c0_16 = arith.constant 0 : index
    %c0_17 = arith.constant 0 : index
    %21 = vector.load %arg1[%c0_15, %c0_16, %c0_17] : memref<8x16x256xf32, #tpu.memory_space<vmem>>, vector<8x16x256xf32>
    %22 = vector.shape_cast %20 : vector<8x16xf32> to vector<8x16x1xf32>
    %23 = vector.broadcast %22 : vector<8x16x1xf32> to vector<8x16x256xf32>
    %24 = arith.mulf %21, %23 : vector<8x16x256xf32>
    %c0_18 = arith.constant 0 : index
    %c0_19 = arith.constant 0 : index
    %c0_20 = arith.constant 0 : index
    %25 = vector.load %arg6[%c0_18, %c0_19, %c0_20] : memref<8x16x256xf32, #tpu.memory_space<vmem>>, vector<8x16x256xf32>
    tpu.vector_store %arg6[%c0_18, %c0_19, %c0_20], %24 {strides = array<i32>} : memref<8x16x256xf32, #tpu.memory_space<vmem>>, vector<8x16x256xf32>,
    return
  }
  func.func @transform_0(%arg0: i32) -> (i32, i32, i32) {
    %c0_i32 = arith.constant 0 : i32
    %c0_i32_0 = arith.constant 0 : i32
    %c0_i32_1 = arith.constant 0 : i32
    return %arg0, %c0_i32, %c0_i32_0 : i32, i32, i32
  }
  func.func @transform_1(%arg0: i32) -> (i32, i32) {
    %c0_i32 = arith.constant 0 : i32
    %c0_i32_0 = arith.constant 0 : i32
    %c0_i32_1 = arith.constant 0 : i32
    return %c0_i32, %c0_i32_0 : i32, i32
  }
  func.func @transform_2(%arg0: i32) -> (i32, i32) {
    %c0_i32 = arith.constant 0 : i32
    %c0_i32_0 = arith.constant 0 : i32
    %c0_i32_1 = arith.constant 0 : i32
    return %c0_i32, %c0_i32_0 : i32, i32
  }
  func.func @transform_3(%arg0: i32) -> (i32, i32) {
    %c0_i32 = arith.constant 0 : i32
    %c0_i32_0 = arith.constant 0 : i32
    %c0_i32_1 = arith.constant 0 : i32
    return %c0_i32, %c0_i32_0 : i32, i32
  }
  func.func @transform_4(%arg0: i32) -> (i32, i32) {
    %c0_i32 = arith.constant 0 : i32
    %c0_i32_0 = arith.constant 0 : i32
    %c0_i32_1 = arith.constant 0 : i32
    return %c0_i32, %c0_i32_0 : i32, i32
  }
  func.func @transform_5(%arg0: i32) -> (i32, i32, i32) {
    %c0_i32 = arith.constant 0 : i32
    %c0_i32_0 = arith.constant 0 : i32
    %c0_i32_1 = arith.constant 0 : i32
    return %arg0, %c0_i32, %c0_i32_0 : i32, i32, i32
  }
}

</mosaic_0001>

<bundles_post_ra>
// kernel: tpu_custom_call.1
= control target key start
LH: loop header
LB: loop body
LE: loop exit
PB: predicated region body
PF: predicated region fallthrough
CT: control target
= control target key end

     0   :  { %10 = vsyncpa [#allocation3], 0  ;;  %s929_s0 = inlined_call_operand.hbm [shape: f32[8,16,256], index: 0, kind: input, shape index: {}]   ;;  %s930_s1 = inlined_call_operand.vmem [shape: f32[16,32], index: 1, kind: input, shape index: {}]   ;;  %s931_s2 = inlined_call_operand.vmem [shape: f32[1,32], index: 2, kind: input, shape index: {}]   ;;  %s932_s3 = inlined_call_operand.vmem [shape: f32[32,16], index: 3, kind: input, shape index: {}]   ;;  %s933_s4 = inlined_call_operand.vmem [shape: f32[1,16], index: 4, kind: input, shape index: {}]   ;;  %s934_s5 = inlined_call_operand.hbm [shape: f32[8,16,256], index: 5, kind: output, shape index: {}]  }
   0x1   :  { %11 = vsyncpa [#allocation4], 0  ;;  %s679_s18 = smov [#allocation2]   ;;  %s631_s22 = scalar_lea.hbm %s929_s0, 4096 }
   0x2   :  { %s17_s19 = sshll.u32 %s679_s18, 4  ;;  %p632_p0 = scmp.ne.s32.totalorder %s929_s0, %s631_s22  ;;  %s18_s19 = int_to_ptr.vmem [resolvable:$true] %s17_s19 }
   0x3   :  { %p635_p1 = scmp.lt.u32.totalorder %s631_s22, %s929_s0 }
   0x5   :  { %p637_p2 = pnand %p635_p1, %p632_p0 }
   0x7   :  { %640 = shalt.err (!%p637_p2)
}
   0x8   :  { %s641_s27 = scalar_lea.vmem %s18_s19, 4096  ;;  %p646_p4 = scmp.lt.s32.totalorder %s18_s19, %s18_s19 }
   0x9   :  { %p642_p3 = scmp.ne.s32.totalorder %s18_s19, %s641_s27  ;;  %p647_p5 = scmp.lt.s32.totalorder %s641_s27, %s641_s27 }
   0xb   :  { %p648_p6 = por %p647_p5, %p646_p4 }
   0xd   :  { %p649_p7 = pnand %p648_p6, %p642_p3 }
   0xf   :  { %652 = shalt.err (!%p649_p7)
}
  0x10   :  { %s680_s28 = smov 256   ;;  %s681_s29 = smov 16  }
  0x11   :  { %23 = dma.hbm_to_vmem [thread:$0]  %s929_s0, 4096, %s18_s19, [#allocation3], %s680_s28, %s680_s28, %s681_s29  }
  0x12   :  { %675 = dma.done.wait [#allocation3], 4096  }
  0x13   :  { %676 = vsyncadd [#allocation3], 4294963200  ;;  %v731_v0 = vld [vmem:[#allocation2 + $0x20] sm:$0xff]  ;;  %v733_v1 = vld [vmem:[#allocation2 + $0x28] sm:$0xff]  ;;  %v682_v51 = vmov 0.0|0.0   ;;  %vm683_vm0 = vmmov 0   ;;  %v156_v60 = vlaneseq }
  0x14   :  { %v735_v2 = vld [vmem:[#allocation2] sm:$0xff]  ;;  %v73_v3 = vadd.f32 %v733_v1, %v731_v0  ;;  %v739_v4 = vld [vmem:[#allocation2 + $0x8] sm:$0xff]  ;;  %v741_v5 = vld [vmem:[#allocation2 + $0x30] sm:$0xff]  ;;  %611 = vmatprep.subr.bf16.mxu0 %v682_v51  ;;  %614 = vmatprep.subr.bf16.mxu1 %v682_v51  ;;  %v684_v52 = vmov 0.0   ;;  %vm167_vm1 = vcmask 130112   ;;  %vm232_vm2 = vcmask 1041409  }
  0x15   :  { %v743_v6 = vld [vmem:[#allocation2 + $0x38] sm:$0xff]  ;;  %v67_v7 = vadd.f32 %v739_v4, %v735_v2  ;;  %v747_v8 = vld [vmem:[#allocation2 + $0x10] sm:$0xff]  ;;  %v759_v14 = vld [vmem:[#allocation2 + $0x40] sm:$0xff]  ;;  %597 = vmatprep.mubr.msk.f32.mxu0 %vm683_vm0, %v684_v52  ;;  %608 = vmatprep.mubr.msk.f32.mxu1 %vm683_vm0, %v684_v52  ;;  %v157_v63 = vand.u32 127, %v156_v60  ;;  %vm234_vm3 = vcmask 1042434   ;;  %vm236_vm4 = vcmask 1043459  }
  0x16   :  { %v749_v9 = vld [vmem:[#allocation2 + $0x18] sm:$0xff]  ;;  %74 = vadd.xlane.f32.xlu1 %v73_v3  ;;  %v76_v10 = vadd.f32 %v743_v6, %v741_v5  ;;  %v755_v12 = vld [vmem:[#allocation2 + $0x50] sm:$0xff]  ;;  %v761_v15 = vld [vmem:[#allocation2 + $0x48] sm:$0xff]  ;;  %vm238_vm5 = vcmask 1044484   ;;  %vm240_vm6 = vcmask 1045509   ;;  %vm242_vm7 = vcmask 1046534  }
  0x17   :  { %68 = vadd.xlane.f32.xlu0 %v67_v7  ;;  %v70_v11 = vadd.f32 %v749_v9, %v747_v8  ;;  %v757_v13 = vld [vmem:[#allocation2 + $0x58] sm:$0xff]  ;;  %v79_v17 = vadd.f32 %v761_v15, %v759_v14  ;;  %v767_v18 = vld [vmem:[#allocation2 + $0x70] sm:$0xff]  ;;  %v771_v20 = vld [vmem:[#allocation2 + $0x60] sm:$0xff]  ;;  %v162_v7 = vadd.s32 4294967288, %v157_v63  ;;  %vm244_vm8 = vcmask 1047559  }
  0x18   :  { %v82_v16 = vadd.f32 %v757_v13, %v755_v12  ;;  %v769_v19 = vld [vmem:[#allocation2 + $0x78] sm:$0xff]  ;;  %v773_v21 = vld [vmem:[#allocation2 + $0x68] sm:$0xff]  ;;  %v779_v24 = vld [vmem:[#allocation2 + $0x90] sm:$0xff]  ;;  %vm246_vm9 = vcmask 130048   ;;  %vm331_vm10 = vcmask 261120  }
  0x19   :  { %v88_v22 = vadd.f32 %v769_v19, %v767_v18  ;;  %v85_v23 = vadd.f32 %v773_v21, %v771_v20  ;;  %v781_v25 = vld [vmem:[#allocation2 + $0x98] sm:$0xff]  ;;  %v783_v26 = vld [vmem:[#allocation2 + $0x80] sm:$0xff]  ;;  %v785_v27 = vld [vmem:[#allocation2 + $0x88] sm:$0xff] }
  0x1a   :  { %77 = vadd.xlane.f32.xlu1 %v76_v10  ;;  %v94_v28 = vadd.f32 %v781_v25, %v779_v24  ;;  %v91_v29 = vadd.f32 %v785_v27, %v783_v26  ;;  %v791_v30 = vld [vmem:[#allocation2 + $0xb0] sm:$0xff]  ;;  %v793_v31 = vld [vmem:[#allocation2 + $0xb8] sm:$0xff]  ;;  %v795_v32 = vld [vmem:[#allocation2 + $0xa0] sm:$0xff] }
  0x1b   :  { %71 = vadd.xlane.f32.xlu0 %v70_v11  ;;  %v797_v33 = vld [vmem:[#allocation2 + $0xa8] sm:$0xff]  ;;  %v100_v34 = vadd.f32 %v793_v31, %v791_v30  ;;  %v803_v36 = vld [vmem:[#allocation2 + $0xd0] sm:$0xff]  ;;  %v805_v37 = vld [vmem:[#allocation2 + $0xd8] sm:$0xff]  ;;  %v839_v11 = vshrl.u32 %v156_v60, 7 }
  0x1c   :  { %v97_v35 = vadd.f32 %v797_v33, %v795_v32  ;;  %v807_v38 = vld [vmem:[#allocation2 + $0xc0] sm:$0xff]  ;;  %v809_v39 = vld [vmem:[#allocation2 + $0xc8] sm:$0xff]  ;;  %v106_v40 = vadd.f32 %v805_v37, %v803_v36  ;;  %v815_v42 = vld [vmem:[#allocation2 + $0xf0] sm:$0xff] }
  0x1d   :  { %v103_v41 = vadd.f32 %v809_v39, %v807_v38  ;;  %v817_v43 = vld [vmem:[#allocation2 + $0xf8] sm:$0xff]  ;;  %v819_v44 = vld [vmem:[#allocation2 + $0xe0] sm:$0xff]  ;;  %v821_v45 = vld [vmem:[#allocation2 + $0xe8] sm:$0xff] }
  0x1e   :  { %83 = vadd.xlane.f32.xlu1 %v82_v16  ;;  %v112_v46 = vadd.f32 %v817_v43, %v815_v42  ;;  %v109_v47 = vadd.f32 %v821_v45, %v819_v44  ;;  %v131_v48 = vld [vmem:[%s930_s1] sm:$0xff]  ;;  %v132_v49 = vld [vmem:[%s930_s1 + $0x8] sm:$0xff] }
  0x1f   :  { %80 = vadd.xlane.f32.xlu0 %v79_v17  ;;  %v612_v50 = vpack.c.bf16 %v132_v49, %v131_v48  ;;  %v320_v53 = vld [vmem:[%s932_s3] sm:$0xff]  ;;  %v321_v54 = vld [vmem:[%s932_s3 + $0x8] sm:$0xff]  ;;  %v842_v17 = vsub.s32 %v162_v7, %v839_v11 }
  0x20   :  { %v615_v55 = vpack.c.bf16 %v321_v54, %v320_v53 }
  0x21   :  { %613 = vmatpush3.bf16.msra.mxu0 %v612_v50 }
  0x22   :  { %89 = vadd.xlane.f32.xlu1 %v88_v22  ;;  %616 = vmatpush3.bf16.msra.mxu1 %v615_v55 }
  0x23   :  { %86 = vadd.xlane.f32.xlu0 %v85_v23  ;;  %617 = vmatprep.subr.bf16.mxu1 %v682_v51 }
  0x26   :  { %95 = vadd.xlane.f32.xlu1 %v94_v28 }
  0x27   :  { %92 = vadd.xlane.f32.xlu0 %v91_v29  ;;  %v160_v29 = vsub.s32 %v157_v63, %v839_v11 }
  0x2a   :  { %101 = vadd.xlane.f32.xlu1 %v100_v34 }
  0x2b   :  { %98 = vadd.xlane.f32.xlu0 %v97_v35 }
  0x2e   :  { %107 = vadd.xlane.f32.xlu1 %v106_v40 }
  0x2f   :  { %104 = vadd.xlane.f32.xlu0 %v103_v41 }
  0x32   :  { %113 = vadd.xlane.f32.xlu1 %v112_v46 }
  0x33   :  { %110 = vadd.xlane.f32.xlu0 %v109_v47 }
  0xa3   :  { %v75_v56 = vpop.xlane.xlu1 %74 }
  0xa4   :  { %v69_v57 = vpop.xlane.xlu0 %68  ;;  %v117_v34 = vmul.f32 0.005, %v75_v56 }
  0xa5   :  { %v115_v41 = vmul.f32 0.005, %v69_v57 }
  0xa7   :  { %v78_v58 = vpop.xlane.xlu1 %77  ;;  %v161_v60 = vrot.slane %v115_v41, %v160_v29 }
  0xa8   :  { %v72_v59 = vpop.xlane.xlu0 %71  ;;  %v118_v22 = vmul.f32 0.005, %v78_v58  ;;  %v172_v58 = vrot.slane %v117_v34, %v160_v29 }
  0xa9   :  { %v116_v28 = vmul.f32 0.005, %v72_v59 }
  0xaa   :  { %v176_v49 = vrot.slane %v118_v22, %v842_v17 }
  0xab   :  { %v84_v61 = vpop.xlane.xlu1 %83  ;;  %v166_v53 = vrot.slane %v116_v28, %v842_v17 }
  0xac   :  { %v81_v62 = vpop.xlane.xlu0 %80  ;;  %v120_v35 = vmul.f32 0.005, %v84_v61  ;;  %v177_v63 = vsel %vm167_vm1, %v176_v49, %v172_v58 }
  0xad   :  { %v119_v40 = vmul.f32 0.005, %v81_v62  ;;  %v168_v22 = vsel %vm167_vm1, %v166_v53, %v161_v60 }
  0xae   :  { %v185_v59 = vrot.slane %v120_v35, %v842_v17 }
  0xaf   :  { %v90_v3 = vpop.xlane.xlu1 %89  ;;  %v181_v56 = vrot.slane %v119_v40, %v160_v29 }
  0xb0   :  { %v87_v10 = vpop.xlane.xlu0 %86  ;;  %v122_v46 = vmul.f32 0.005, %v90_v3 }
  0xb1   :  { %v121_v47 = vmul.f32 0.005, %v87_v10  ;;  %v186_v35 = vsel %vm167_vm1, %v185_v59, %v181_v56 }
  0xb2   :  { %v194_v57 = vrot.slane %v122_v46, %v842_v17 }
  0xb3   :  { %v96_v16 = vpop.xlane.xlu1 %95  ;;  %v190_v61 = vrot.slane %v121_v47, %v160_v29 }
  0xb4   :  { %v93_v23 = vpop.xlane.xlu0 %92  ;;  %v124_v50 = vmul.f32 0.005, %v96_v16 }
  0xb5   :  { %v123_v51 = vmul.f32 0.005, %v93_v23  ;;  %v195_v41 = vsel %vm167_vm1, %v194_v57, %v190_v61 }
  0xb6   :  { %v203_v3 = vrot.slane %v124_v50, %v842_v17 }
  0xb7   :  { %v102_v48 = vpop.xlane.xlu1 %101  ;;  %v199_v7 = vrot.slane %v123_v51, %v160_v29 }
  0xb8   :  { %v99_v52 = vpop.xlane.xlu0 %98  ;;  %v126_v54 = vmul.f32 0.005, %v102_v48  ;;  %v233_v48 = vsel %vm232_vm2, %v177_v63, %v168_v22 }
  0xb9   :  { %v125_v55 = vmul.f32 0.005, %v99_v52  ;;  %v204_v49 = vsel %vm167_vm1, %v203_v3, %v199_v7  ;;  %v235_v52 = vsel %vm234_vm3, %v186_v35, %v233_v48  ;;  %v322_v3 = vld [vmem:[%s932_s3 + $0x10] sm:$0xff]  ;;  %v323_v7 = vld [vmem:[%s932_s3 + $0x18] sm:$0xff]  ;;  %v413_v48 = vsub.s32 0, %v839_v11 }
  0xba   :  { %v212_v23 = vrot.slane %v126_v54, %v842_v17 }
  0xbb   :  { %v108_v62 = vpop.xlane.xlu1 %107  ;;  %v208_v28 = vrot.slane %v125_v55, %v160_v29  ;;  %v237_v55 = vsel %vm236_vm4, %v195_v41, %v235_v52  ;;  %v435_v52 = vsub.s32 2, %v839_v11 }
  0xbc   :  { %v128_v10 = vmul.f32 0.005, %v108_v62  ;;  %v105_v16 = vpop.xlane.xlu0 %104  ;;  %v239_v56 = vsel %vm238_vm5, %v204_v49, %v237_v55  ;;  %v446_v55 = vsub.s32 3, %v839_v11 }
  0xbd   :  { %v127_v34 = vmul.f32 0.005, %v105_v16  ;;  %v213_v53 = vsel %vm167_vm1, %v212_v23, %v208_v28  ;;  %v582_v28 = vld [vmem:[%s933_s4] ss:$0 sm:$0xff] }
  0xbe   :  { %v221_v40 = vrot.slane %v128_v10, %v842_v17  ;;  %v241_v57 = vsel %vm240_vm6, %v213_v53, %v239_v56 }
  0xbf   :  { %v217_v46 = vrot.slane %v127_v34, %v160_v29  ;;  %v114_v47 = vpop.xlane.xlu1 %113 }
  0xc0   :  { %v130_v50 = vmul.f32 0.005, %v114_v47  ;;  %v111_v51 = vpop.xlane.xlu0 %110 }
  0xc1   :  { %v129_v54 = vmul.f32 0.005, %v111_v51  ;;  %v222_v58 = vsel %vm167_vm1, %v221_v40, %v217_v46  ;;  %v424_v51 = vsub.s32 1, %v839_v11 }
  0xc2   :  { %v230_v59 = vrot.slane %v130_v50, %v842_v17  ;;  %v243_v62 = vsel %vm242_vm7, %v222_v58, %v241_v57  ;;  %v618_v17 = vpack.c.bf16 %v323_v7, %v322_v3 }
  0xc3   :  { %v226_v60 = vrot.slane %v129_v54, %v160_v29  ;;  %v580_v29 = vld [vmem:[%s931_s2] ss:$0 sm:$0xff]  ;;  %s685_s2 = smov [#allocation5]  }
  0xc4   :  { %619 = vmatpush3.bf16.msra.mxu1 %v618_v17  ;;  %s568_s3 = sshll.u32 %s685_s2, 4  ;;  %s569_s3 = int_to_ptr.vmem [resolvable:$true] %s568_s3 }
  0xc5   :  { %v231_v61 = vsel %vm167_vm1, %v230_v59, %v226_v60  ;;  %v457_v59 = vsub.s32 4, %v839_v11  ;;  %v468_v60 = vsub.s32 5, %v839_v11  ;;  %s653_s4 = scalar_lea.vmem %s569_s3, 4096  ;;  %p658_p9 = scmp.lt.s32.totalorder %s569_s3, %s569_s3 }
  0xc6   :  { %v245_v63 = vsel %vm244_vm8, %v231_v61, %v243_v62  ;;  %v479_v61 = vsub.s32 6, %v839_v11  ;;  %p654_p8 = scmp.ne.s32.totalorder %s569_s3, %s653_s4  ;;  %p659_p10 = scmp.lt.s32.totalorder %s653_s4, %s653_s4 }
  0xc7   :  { %598 = vmatmul.mubr.msk.f32.vlgmr.msra.gmra.mrb[0].mxu0 %vm246_vm9, %v245_v63  ;;  %v490_v63 = vsub.s32 7, %v839_v11 }
  0xc8   :  { %p660_p11 = por %p659_p10, %p658_p9 }
  0xca   :  { %p661_p12 = pnand %p660_p11, %p654_p8 }
 0x19a   :  { %v315_v10 = vpop.f32.mrb[0].mxu0 }
 0x19b   :  { %v316_v16 = vadd.f32 %v580_v29, %v315_v10  ;;  %v599_v22 = vpop.f32.mrb[1].mxu0 }
 0x19d   :  { %v319_v23 = vmax.f32 %v316_v16, 0.0 }
 0x19f   :  { %609 = vmatmul.mubr.msk.f32.vlgmr.msra.gmra.mrb[0].mxu1 %vm331_vm10, %v319_v23 }
 0x272   :  { %v401_v34 = vpop.f32.mrb[0].mxu1 }
 0x273   :  { %v402_v35 = vadd.f32 %v582_v28, %v401_v34  ;;  %v610_v40 = vpop.f32.mrb[1].mxu1 }
 0x275   :  { %v584_v41 = vmul.f32 -1.442695, %v402_v35 }
 0x277   :  { %627 = vpow2.f32 %v584_v41 }
 0x281   :  { %v628_v46 = vpop.eup %627 }
 0x282   :  { %v408_v47 = vadd.f32 1.0, %v628_v46 }
 0x284   :  { %629 = vrcp.f32 %v408_v47 }
 0x28e   :  { %v630_v49 = vpop.eup %629 }
 0x28f   :  { %v414_v50 = vrot.slane %v630_v49, %v413_v48  ;;  %v425_v53 = vrot.slane %v630_v49, %v424_v51  ;;  %v436_v54 = vrot.slane %v630_v49, %v435_v52  ;;  %v447_v58 = vrot.slane %v630_v49, %v446_v55 }
 0x290   :  { %v458_v56 = vrot.slane %v630_v49, %v457_v59  ;;  %v469_v57 = vrot.slane %v630_v49, %v468_v60  ;;  %v480_v62 = vrot.slane %v630_v49, %v479_v61  ;;  %v491_v3 = vrot.slane %v630_v49, %v490_v63 }
 0x291   :  { %420 = vbcast.lane.b32.xlu1 %v414_v50, 264  ;;  %416 = vbcast.lane.b32.xlu0 %v414_v50, 256 }
 0x295   :  { %427 = vbcast.lane.b32.xlu1 %v425_v53, 256  ;;  %438 = vbcast.lane.b32.xlu0 %v436_v54, 256 }
 0x299   :  { %431 = vbcast.lane.b32.xlu1 %v425_v53, 264  ;;  %449 = vbcast.lane.b32.xlu0 %v447_v58, 256 }
 0x29d   :  { %442 = vbcast.lane.b32.xlu1 %v436_v54, 264  ;;  %460 = vbcast.lane.b32.xlu0 %v458_v56, 256 }
 0x2a1   :  { %453 = vbcast.lane.b32.xlu1 %v447_v58, 264  ;;  %471 = vbcast.lane.b32.xlu0 %v469_v57, 256 }
 0x2a5   :  { %464 = vbcast.lane.b32.xlu1 %v458_v56, 264  ;;  %482 = vbcast.lane.b32.xlu0 %v480_v62, 256 }
 0x2a9   :  { %475 = vbcast.lane.b32.xlu1 %v469_v57, 264  ;;  %493 = vbcast.lane.b32.xlu0 %v491_v3, 256 }
 0x2ad   :  { %486 = vbcast.lane.b32.xlu1 %v480_v62, 264 }
 0x2b1   :  { %497 = vbcast.lane.b32.xlu1 %v491_v3, 264 }
 0x303   :  { %v421_v7 = vpop.permute.xlu1 %420  ;;  %v417_v17 = vpop.permute.xlu0 %416 }
 0x304   :  { %v501_v29 = vmul.f32 %v421_v7, %v747_v8  ;;  %v502_v10 = vmul.f32 %v421_v7, %v749_v9  ;;  %v499_v16 = vmul.f32 %v417_v17, %v735_v2  ;;  %v500_v22 = vmul.f32 %v417_v17, %v739_v4 }
 0x306   :  { %533 = vst [vmem:[#allocation5 + $0x10] sm:$0xff] %v501_v29  ;;  %534 = vst [vmem:[#allocation5 + $0x18] sm:$0xff] %v502_v10 }
 0x307   :  { %531 = vst [vmem:[#allocation5] sm:$0xff] %v499_v16  ;;  %532 = vst [vmem:[#allocation5 + $0x8] sm:$0xff] %v500_v22  ;;  %v428_v11 = vpop.permute.xlu1 %427  ;;  %v439_v23 = vpop.permute.xlu0 %438 }
 0x308   :  { %v503_v28 = vmul.f32 %v428_v11, %v731_v0  ;;  %v504_v34 = vmul.f32 %v428_v11, %v733_v1  ;;  %v507_v35 = vmul.f32 %v439_v23, %v759_v14  ;;  %v508_v8 = vmul.f32 %v439_v23, %v761_v15 }
 0x30a   :  { %535 = vst [vmem:[#allocation5 + $0x20] sm:$0xff] %v503_v28  ;;  %536 = vst [vmem:[#allocation5 + $0x28] sm:$0xff] %v504_v34 }
 0x30b   :  { %539 = vst [vmem:[#allocation5 + $0x40] sm:$0xff] %v507_v35  ;;  %540 = vst [vmem:[#allocation5 + $0x48] sm:$0xff] %v508_v8  ;;  %v432_v2 = vpop.permute.xlu1 %431  ;;  %v450_v4 = vpop.permute.xlu0 %449 }
 0x30c   :  { %v505_v9 = vmul.f32 %v432_v2, %v741_v5  ;;  %v506_v40 = vmul.f32 %v432_v2, %v743_v6  ;;  %v511_v41 = vmul.f32 %v450_v4, %v771_v20  ;;  %v512_v0 = vmul.f32 %v450_v4, %v773_v21 }
 0x30e   :  { %537 = vst [vmem:[#allocation5 + $0x30] sm:$0xff] %v505_v9  ;;  %538 = vst [vmem:[#allocation5 + $0x38] sm:$0xff] %v506_v40 }
 0x30f   :  { %543 = vst [vmem:[#allocation5 + $0x60] sm:$0xff] %v511_v41  ;;  %544 = vst [vmem:[#allocation5 + $0x68] sm:$0xff] %v512_v0  ;;  %v443_v1 = vpop.permute.xlu1 %442  ;;  %v461_v14 = vpop.permute.xlu0 %460 }
 0x310   :  { %v509_v15 = vmul.f32 %v443_v1, %v755_v12  ;;  %v510_v46 = vmul.f32 %v443_v1, %v757_v13  ;;  %v515_v47 = vmul.f32 %v461_v14, %v783_v26  ;;  %v516_v5 = vmul.f32 %v461_v14, %v785_v27 }
 0x312   :  { %541 = vst [vmem:[#allocation5 + $0x50] sm:$0xff] %v509_v15  ;;  %542 = vst [vmem:[#allocation5 + $0x58] sm:$0xff] %v510_v46 }
 0x313   :  { %547 = vst [vmem:[#allocation5 + $0x80] sm:$0xff] %v515_v47  ;;  %548 = vst [vmem:[#allocation5 + $0x88] sm:$0xff] %v516_v5  ;;  %v454_v6 = vpop.permute.xlu1 %453  ;;  %v472_v20 = vpop.permute.xlu0 %471 }
 0x314   :  { %v513_v21 = vmul.f32 %v454_v6, %v767_v18  ;;  %v514_v48 = vmul.f32 %v454_v6, %v769_v19  ;;  %v519_v49 = vmul.f32 %v472_v20, %v795_v32  ;;  %v520_v12 = vmul.f32 %v472_v20, %v797_v33 }
 0x316   :  { %545 = vst [vmem:[#allocation5 + $0x70] sm:$0xff] %v513_v21  ;;  %546 = vst [vmem:[#allocation5 + $0x78] sm:$0xff] %v514_v48 }
 0x317   :  { %551 = vst [vmem:[#allocation5 + $0xa0] sm:$0xff] %v519_v49  ;;  %552 = vst [vmem:[#allocation5 + $0xa8] sm:$0xff] %v520_v12  ;;  %v465_v13 = vpop.permute.xlu1 %464  ;;  %v483_v26 = vpop.permute.xlu0 %482 }
 0x318   :  { %v517_v27 = vmul.f32 %v465_v13, %v779_v24  ;;  %v518_v50 = vmul.f32 %v465_v13, %v781_v25  ;;  %v523_v51 = vmul.f32 %v483_v26, %v807_v38  ;;  %v524_v18 = vmul.f32 %v483_v26, %v809_v39 }
 0x31a   :  { %549 = vst [vmem:[#allocation5 + $0x90] sm:$0xff] %v517_v27  ;;  %550 = vst [vmem:[#allocation5 + $0x98] sm:$0xff] %v518_v50 }
 0x31b   :  { %555 = vst [vmem:[#allocation5 + $0xc0] sm:$0xff] %v523_v51  ;;  %556 = vst [vmem:[#allocation5 + $0xc8] sm:$0xff] %v524_v18  ;;  %v476_v19 = vpop.permute.xlu1 %475  ;;  %v494_v32 = vpop.permute.xlu0 %493 }
 0x31c   :  { %v521_v33 = vmul.f32 %v476_v19, %v791_v30  ;;  %v522_v52 = vmul.f32 %v476_v19, %v793_v31  ;;  %v527_v53 = vmul.f32 %v494_v32, %v819_v44  ;;  %v528_v24 = vmul.f32 %v494_v32, %v821_v45 }
 0x31e   :  { %553 = vst [vmem:[#allocation5 + $0xb0] sm:$0xff] %v521_v33  ;;  %554 = vst [vmem:[#allocation5 + $0xb8] sm:$0xff] %v522_v52 }
 0x31f   :  { %559 = vst [vmem:[#allocation5 + $0xe0] sm:$0xff] %v527_v53  ;;  %560 = vst [vmem:[#allocation5 + $0xe8] sm:$0xff] %v528_v24  ;;  %v487_v25 = vpop.permute.xlu1 %486 }
 0x320   :  { %v525_v38 = vmul.f32 %v487_v25, %v803_v36  ;;  %v526_v39 = vmul.f32 %v487_v25, %v805_v37 }
 0x322   :  { %557 = vst [vmem:[#allocation5 + $0xd0] sm:$0xff] %v525_v38  ;;  %558 = vst [vmem:[#allocation5 + $0xd8] sm:$0xff] %v526_v39 }
 0x323   :  { %v498_v30 = vpop.permute.xlu1 %497 }
 0x324   :  { %v529_v31 = vmul.f32 %v498_v30, %v815_v42  ;;  %v530_v44 = vmul.f32 %v498_v30, %v817_v43 }
 0x326   :  { %561 = vst [vmem:[#allocation5 + $0xf0] sm:$0xff] %v529_v31  ;;  %562 = vst [vmem:[#allocation5 + $0xf8] sm:$0xff] %v530_v44 }
 0x327   :  { %664 = shalt.err (!%p661_p12)
}
 0x328   :  { %s665_s23 = scalar_lea.hbm %s934_s5, 4096 }
 0x329   :  { %p666_p13 = scmp.ne.s32.totalorder %s934_s5, %s665_s23  ;;  %p669_p0 = scmp.lt.u32.totalorder %s665_s23, %s934_s5 }
 0x32b   :  { %p671_p1 = pnand %p669_p0, %p666_p13 }
 0x32d   :  { %674 = shalt.err (!%p671_p1)
}
 0x32e   :  { %574 = dma.vmem_to_hbm [thread:$0]  %s569_s3, 4096, %s934_s5, [#allocation4], %s680_s28, %s680_s28, %s681_s29  }
 0x32f   :  { %677 = dma.done.wait [#allocation4], 4096  }
 0x330   :  { %678 = vsyncadd [#allocation4], 4294963200 }
 0x331   :  { %578 = vsyncpa [#allocation3], 1 }
 0x332   :  { %579 = vsyncpa [#allocation4], 1 }

</bundles_post_ra>
